<compile_context>
chip_gen: v7x
topology: tpu7x:2x2x1
jax: 0.10.0
libtpu: 0.0.40
codegen_flags: <defaults>
</compile_context>

<pallas_src>
import functools

import jax
import jax.numpy as jnp
from jax.experimental import pallas as pl
from jax.experimental.pallas import tpu as pltpu


def _l2_normalize_kernel(x_ref, o_ref):
    x = x_ref[...].astype(jnp.float32)
    sq = jnp.sum(x * x, axis=1, keepdims=True)
    # F.normalize(p=2, dim=1): x / max(||x||, 1e-12) == x * rsqrt(max(sq, 1e-24))
    inv = jax.lax.rsqrt(jnp.maximum(sq, 1e-24))
    o_ref[...] = (x * inv).astype(o_ref.dtype)


def _drcl_tile_kernel(t_ref, im_ref, mask_ref, out_ref, *,
                      alpha, lambda_neg, gamma_semi):
    i = pl.program_id(0)
    j = pl.program_id(1)

    t = t_ref[...]        # (TM, D) f32, already L2-normalized
    im = im_ref[...]      # (TN, D) f32, already L2-normalized
    tm = t.shape[0]
    tn = im.shape[0]

    # sim = t @ im.T without materializing the transpose: contract last dims.
    # TODO(synk): optionally cast MXU operands to bf16 on v6e/v7x (f32 acc);
    # kept f32 here for bit-level parity with the f32 reference.
    sim = jax.lax.dot_general(
        t, im, dimension_numbers=(((1,), (1,)), ((), ())),
        preferred_element_type=jnp.float32)        # (TM, TN)

    # Global row / column indices of this tile -> diagonal (positive) mask.
    row = i * tm + jax.lax.broadcasted_iota(jnp.int32, (tm, tn), 0)
    col = j * tn + jax.lax.broadcasted_iota(jnp.int32, (tm, tn), 1)
    positive = row == col
    semi = jnp.logical_and(mask_ref[...] > 0, jnp.logical_not(positive))

    # Fused masked reduction with the loss weights folded in (single XLU sum).
    pos_term = (sim - 1.0) ** 2
    semi_term = gamma_semi * jnp.maximum(alpha - sim, 0.0) ** 2
    neg_term = lambda_neg * jnp.maximum(sim, 0.0) ** 2
    contrib = jnp.where(positive, pos_term,
                        jnp.where(semi, semi_term, neg_term))
    partial = jnp.sum(contrib)

    # Lane-dense (8, 128) output tile: partial at [0, 0], zeros elsewhere.
    r8 = jax.lax.broadcasted_iota(jnp.int32, (8, 128), 0)
    c128 = jax.lax.broadcasted_iota(jnp.int32, (8, 128), 1)
    out_ref[...] = jnp.where((r8 == 0) & (c128 == 0), partial, 0.0)


def _pick_tile(b):
    for t in (256, 128):
        if b % t == 0:
            return t
    return b  # small / odd batch: single full-extent tile along this axis


def double_relaxed_contrastive_loss_pallas(text_embeddings,
                                           image_embeddings,
                                           semi_positive_mask,
                                           alpha=0.7,
                                           lambda_neg=0.7,
                                           gamma_semi=0.7):
    """semi_positive_mask: int8 (B, B), 1 where a pseudo-gt id maps to column idx."""
    B, D = text_embeddings.shape
    assert image_embeddings.shape == (B, D)
    assert semi_positive_mask.shape == (B, B)

    tile = _pick_tile(B)
    g = B // tile
    tm = tn = tile
    gi = gj = g

    # ---- pass 1: L2-normalize both embedding matrices (one read/write each).
    norm_call = pl.pallas_call(
        _l2_normalize_kernel,
        out_shape=jax.ShapeDtypeStruct((B, D), jnp.float32),
        grid=(g,),
        in_specs=[pl.BlockSpec((tile, D), lambda i: (i, 0))],
        out_specs=pl.BlockSpec((tile, D), lambda i: (i, 0)),
        compiler_params=pltpu.CompilerParams(
            dimension_semantics=("parallel",)),
    )
    t_n = norm_call(text_embeddings)
    im_n = norm_call(image_embeddings)

    # ---- pass 2: tiled similarity + fused masked hinge reduction.
    kernel = functools.partial(_drcl_tile_kernel,
                               alpha=float(alpha),
                               lambda_neg=float(lambda_neg),
                               gamma_semi=float(gamma_semi))

    # VMEM budget: double-buffered input tiles + int8 mask tile + output tile
    # + in-kernel f32 temporaries (sim / contrib / masks).
    vmem_bytes = (2 * tm * D * 4 + 2 * tn * D * 4 + 2 * tm * tn
                  + 2 * 8 * 128 * 4 + 6 * tm * tn * 4)
    vmem_limit = int(min(max(2 * vmem_bytes, 32 * 1024 * 1024),
                         64 * 1024 * 1024))

    cost = pl.CostEstimate(
        flops=2 * B * B * D + 8 * B * B,
        transcendentals=0,
        bytes_accessed=(B * D * 4 * gj + B * D * 4 * gi
                        + B * B * 1 + gi * gj * 8 * 128 * 4),
    )

    partials = pl.pallas_call(
        kernel,
        out_shape=jax.ShapeDtypeStruct((gi * 8, gj * 128), jnp.float32),
        grid=(gi, gj),
        in_specs=[
            pl.BlockSpec((tm, D), lambda i, j: (i, 0)),
            pl.BlockSpec((tn, D), lambda i, j: (j, 0)),
            pl.BlockSpec((tm, tn), lambda i, j: (i, j)),
        ],
        out_specs=pl.BlockSpec((8, 128), lambda i, j: (i, j)),
        compiler_params=pltpu.CompilerParams(
            dimension_semantics=("parallel", "parallel"),
            vmem_limit_bytes=vmem_limit),
        cost_estimate=cost,
    )(t_n, im_n, semi_positive_mask)

    # Each tile wrote its partial to a single element of its (8,128) slab.
    return jnp.sum(partials)


def build_semi_positive_mask(batch_size, gt_img_ids, pseudo_gt_img_ids):
    """Host-side glue mirroring the PyTorch dict/list bookkeeping. int8 output."""
    flattened_gt_img_ids = [item for sublist in gt_img_ids for item in sublist]
    id_to_index = {flattened_gt_img_ids[i]: i
                   for i in range(len(flattened_gt_img_ids))}
    mask = [[0] * batch_size for _ in range(batch_size)]
    for i in range(batch_size):
        valid_indices = [id_to_index.get(pseudo_gt_img_ids[j][i], -1)
                         for j in range(len(pseudo_gt_img_ids))]
        for idx in valid_indices:
            if idx != -1 and idx != i:
                mask[i][idx] = 1
    return jnp.asarray(mask, dtype=jnp.int8)


def _reference_loss(text, image, semi_mask, alpha, lambda_neg, gamma_semi):
    t = text / jnp.maximum(
        jnp.linalg.norm(text, axis=1, keepdims=True), 1e-12)
    im = image / jnp.maximum(
        jnp.linalg.norm(image, axis=1, keepdims=True), 1e-12)
    sim = t @ im.T
    b = sim.shape[0]
    eye = jnp.eye(b, dtype=bool)
    semi = (semi_mask > 0) & ~eye
    neg = ~(eye | semi)
    l_pos = jnp.sum(jnp.where(eye, (sim - 1.0) ** 2, 0.0))
    l_semi = jnp.sum(jnp.where(semi, jnp.maximum(alpha - sim, 0.0) ** 2, 0.0))
    l_neg = jnp.sum(jnp.where(neg, jnp.maximum(sim, 0.0) ** 2, 0.0))
    return l_pos + lambda_neg * l_neg + gamma_semi * l_semi


if __name__ == "__main__":
    alpha, lambda_neg, gamma_semi = 0.7, 0.7, 0.7
    B, D = 8, 32

    key = jax.random.PRNGKey(0)
    k1, k2 = jax.random.split(key)
    text_embeddings = jax.random.normal(k1, (B, D), dtype=jnp.float32)
    image_embeddings = jax.random.normal(k2, (B, D), dtype=jnp.float32)

    # Deterministic synthetic ids: each batch element has one gt image id.
    gt_img_ids = [[f"img_{10 * i}"] for i in range(B)]
    # Two pseudo-gt lists, each of length B; some ids hit the gt table,
    # some (the "missing_*") do not -> index -1 in the PyTorch code.
    pseudo_gt_img_ids = [
        [f"img_{10 * ((i + 1) % B)}" for i in range(B)],
        [f"img_{10 * ((i + 3) % B)}" if i % 2 == 0 else f"missing_{i}"
         for i in range(B)],
    ]

    semi_mask = build_semi_positive_mask(B, gt_img_ids, pseudo_gt_img_ids)

    loss = double_relaxed_contrastive_loss_pallas(
        text_embeddings, image_embeddings, semi_mask,
        alpha=alpha, lambda_neg=lambda_neg, gamma_semi=gamma_semi)
    loss = jax.block_until_ready(loss)

    ref = _reference_loss(text_embeddings, image_embeddings, semi_mask,
                          alpha, lambda_neg, gamma_semi)
    assert jnp.allclose(loss, ref, rtol=1e-5, atol=1e-5), (loss, ref)

    print("KERNEL_OK")
</pallas_src>

<mosaic_0001>
module attributes {stable_mosaic.version = 11 : i64} {
  func.func @_l2_normalize_kernel(%arg0: i32, %arg1: memref<8x32xf32, #tpu.memory_space<vmem>>, %arg2: memref<8x32xf32, #tpu.memory_space<vmem>>) attributes {dimension_semantics = [#tpu.dimension_semantics<parallel>], iteration_bounds = array<i64: 1>, scalar_prefetch = 0 : i64, scratch_operands = 0 : i64, tpu.core_type = #tpu.core_type<tc>, window_params = [{transform_indices = @transform_0, window_bounds = array<i64: 8, 32>}, {transform_indices = @transform_1, window_bounds = array<i64: 8, 32>}]} {
    %c0 = arith.constant 0 : index
    %c0_0 = arith.constant 0 : index
    %0 = vector.load %arg1[%c0, %c0_0] : memref<8x32xf32, #tpu.memory_space<vmem>>, vector<8x32xf32>
    %1 = arith.mulf %0, %0 : vector<8x32xf32>
    %cst = arith.constant dense<0.000000e+00> : vector<8xf32>
    %2 = vector.multi_reduction <add>, %1, %cst [1] : vector<8x32xf32> to vector<8xf32>
    %3 = vector.shape_cast %2 : vector<8xf32> to vector<8x1xf32>
    %cst_1 = arith.constant 1.000000e-24 : f32
    %4 = vector.broadcast %cst_1 : f32 to vector<8x1xf32>
    %5 = arith.maximumf %3, %4 : vector<8x1xf32>
    %6 = math.rsqrt %5 : vector<8x1xf32>
    %7 = vector.broadcast %6 : vector<8x1xf32> to vector<8x32xf32>
    %8 = arith.mulf %0, %7 : vector<8x32xf32>
    %c0_2 = arith.constant 0 : index
    %c0_3 = arith.constant 0 : index
    %9 = vector.load %arg2[%c0_2, %c0_3] : memref<8x32xf32, #tpu.memory_space<vmem>>, vector<8x32xf32>
    tpu.vector_store %arg2[%c0_2, %c0_3], %8 {strides = array<i32>} : memref<8x32xf32, #tpu.memory_space<vmem>>, vector<8x32xf32>,
    return
  }
  func.func @transform_0(%arg0: i32) -> (i32, i32) {
    %c0_i32 = arith.constant 0 : i32
    %c0_i32_0 = arith.constant 0 : i32
    return %arg0, %c0_i32 : i32, i32
  }
  func.func @transform_1(%arg0: i32) -> (i32, i32) {
    %c0_i32 = arith.constant 0 : i32
    %c0_i32_0 = arith.constant 0 : i32
    return %arg0, %c0_i32 : i32, i32
  }
}

</mosaic_0001>

<bundles_post_ra>
// kernel: tpu_custom_call.1
= control target key start
LH: loop header
LB: loop body
LE: loop exit
PB: predicated region body
PF: predicated region fallthrough
CT: control target
= control target key end

     0   :  { %6 = vsyncpa [#allocation3], 0  ;;  %s134_s0 = inlined_call_operand.hbm [shape: f32[8,32], index: 0, kind: input, shape index: {}]   ;;  %s135_s1 = inlined_call_operand.hbm [shape: f32[8,32], index: 1, kind: output, shape index: {}]  }
   0x1   :  { %7 = vsyncpa [#allocation4], 0  ;;  %s98_s6 = smov [#allocation2]   ;;  %s50_s10 = scalar_lea.hbm %s134_s0, 128 }
   0x2   :  { %s14_s7 = sshll.u32 %s98_s6, 4  ;;  %p51_p0 = scmp.ne.s32.totalorder %s134_s0, %s50_s10  ;;  %s15_s7 = int_to_ptr.vmem [resolvable:$true] %s14_s7 }
   0x3   :  { %p54_p1 = scmp.lt.u32.totalorder %s50_s10, %s134_s0 }
   0x5   :  { %p56_p2 = pnand %p54_p1, %p51_p0 }
   0x7   :  { %59 = shalt.err (!%p56_p2)
}
   0x8   :  { %s60_s15 = scalar_lea.vmem %s15_s7, 128  ;;  %p65_p4 = scmp.lt.s32.totalorder %s15_s7, %s15_s7 }
   0x9   :  { %p61_p3 = scmp.ne.s32.totalorder %s15_s7, %s60_s15  ;;  %p66_p5 = scmp.lt.s32.totalorder %s60_s15, %s60_s15 }
   0xb   :  { %p67_p6 = por %p66_p5, %p65_p4 }
   0xd   :  { %p68_p7 = pnand %p67_p6, %p61_p3 }
   0xf   :  { %71 = shalt.err (!%p68_p7)
}
  0x10   :  { %17 = dma.hbm_to_vmem [thread:$0]  %s134_s0, 128, %s15_s7, [#allocation3]  }
  0x11   :  { %94 = dma.done.wait [#allocation3], 128  }
  0x12   :  { %95 = vsyncadd [#allocation3], 4294967168  ;;  %v21_v0 = vld [vmem:[#allocation2] sm:$0xff]  ;;  %vm23_vm0 = vcmask 261120   ;;  %s99_s18 = smov [#allocation5]  }
  0x13   :  { %v22_v1 = vmul.f32 %v21_v0, %v21_v0  ;;  %s37_s19 = sshll.u32 %s99_s18, 4  ;;  %s38_s19 = int_to_ptr.vmem [resolvable:$true] %s37_s19 }
  0x14   :  { %s72_s20 = scalar_lea.vmem %s38_s19, 128  ;;  %p77_p9 = scmp.lt.s32.totalorder %s38_s19, %s38_s19 }
  0x15   :  { %v24_v2 = vsel %vm23_vm0, %v22_v1, 0.0  ;;  %p73_p8 = scmp.ne.s32.totalorder %s38_s19, %s72_s20  ;;  %p78_p10 = scmp.lt.s32.totalorder %s72_s20, %s72_s20 }
  0x16   :  { %25 = vadd.xlane.f32.xlu0 %v24_v2 }
  0x17   :  { %p79_p11 = por %p78_p10, %p77_p9 }
  0x19   :  { %p80_p12 = pnand %p79_p11, %p73_p8 }
  0xa3   :  { %v26_v3 = vpop.xlane.xlu0 %25 }
  0xa4   :  { %v27_v4 = vmax.f32 %v26_v3, 1e-24 }
  0xa6   :  { %48 = vrsqrt.f32 %v27_v4 }
  0xb0   :  { %v49_v5 = vpop.eup %48 }
  0xb1   :  { %v29_v6 = vmul.f32 %v49_v5, %v21_v0 }
  0xb3   :  { %30 = vst.msk [vmem:[#allocation5] sm:$0xff] %vm23_vm0, %v29_v6 }
  0xb4   :  { %83 = shalt.err (!%p80_p12)
}
  0xb5   :  { %s84_s22 = scalar_lea.hbm %s135_s1, 128 }
  0xb6   :  { %p85_p13 = scmp.ne.s32.totalorder %s135_s1, %s84_s22  ;;  %p88_p0 = scmp.lt.u32.totalorder %s84_s22, %s135_s1 }
  0xb8   :  { %p90_p1 = pnand %p88_p0, %p85_p13 }
  0xba   :  { %93 = shalt.err (!%p90_p1)
}
  0xbb   :  { %40 = dma.vmem_to_hbm [thread:$0]  %s38_s19, 128, %s135_s1, [#allocation4]  }
  0xbc   :  { %96 = dma.done.wait [#allocation4], 128  }
  0xbd   :  { %97 = vsyncadd [#allocation4], 4294967168 }
  0xbe   :  { %44 = vsyncpa [#allocation3], 1 }
  0xbf   :  { %45 = vsyncpa [#allocation4], 1 }

</bundles_post_ra>
